<compile_context>
chip_gen: v5e
topology: v5e:2x2
jax: 0.10.0
libtpu: 0.0.40
codegen_flags: <defaults>
</compile_context>

<pallas_src>
import functools

import jax
import jax.numpy as jnp
import numpy as np
from jax import lax
from jax.experimental import pallas as pl
from jax.experimental.pallas import tpu as pltpu

BN_EPS = 1e-5
LEAKY_SLOPE = 0.1


def _round_up(x, m):
    return (x + m - 1) // m * m


# ---------------------------------------------------------------------------
# Pass 1: conv matmul (bf16 -> f32 acc) + per-tile channel sum / sum-of-squares
# ---------------------------------------------------------------------------
def _conv_stats_kernel(p_ref, w_ref, y_ref, stats_ref, acc_ref):
    """p_ref: (TM, TK) bf16, w_ref: (TK, Cpad) bf16,
    y_ref: (TM, Cpad) f32, stats_ref: (8, Cpad) f32, acc_ref: (TM, Cpad) f32."""
    k = pl.program_id(1)

    @pl.when(k == 0)
    def _():
        acc_ref[...] = jnp.zeros_like(acc_ref)

    acc_ref[...] += jnp.dot(p_ref[...], w_ref[...],
                            preferred_element_type=jnp.float32)

    @pl.when(k == pl.num_programs(1) - 1)
    def _():
        y = acc_ref[...]
        y_ref[...] = y
        s = jnp.sum(y, axis=0, keepdims=True)        # (1, Cpad) partial sum
        sq = jnp.sum(y * y, axis=0, keepdims=True)   # (1, Cpad) partial sumsq
        row = lax.broadcasted_iota(jnp.int32, stats_ref.shape, 0)
        stats_ref[...] = jnp.where(
            row == 0, jnp.broadcast_to(s, stats_ref.shape),
            jnp.where(row == 1, jnp.broadcast_to(sq, stats_ref.shape), 0.0))


# ---------------------------------------------------------------------------
# Pass 2: normalize (precomputed per-channel scale/shift) + LeakyReLU(0.1)
# ---------------------------------------------------------------------------
def _bn_lrelu_kernel(y_ref, scale_ref, shift_ref, o_ref):
    z = y_ref[...] * scale_ref[...] + shift_ref[...]
    o_ref[...] = jnp.where(z > 0, z, LEAKY_SLOPE * z)


# ---------------------------------------------------------------------------
# Glue: layout / im2col (plain JAX)
# ---------------------------------------------------------------------------
def _im2col_nhwc(x_nhwc, kh, kw, stride, padding):
    """(N*OH*OW, Kh*Kw*Cin) patch matrix, flatten order (ki, kj, cin)."""
    n, h, w, cin = x_nhwc.shape
    xp = jnp.pad(x_nhwc, ((0, 0), (padding, padding), (padding, padding), (0, 0)))
    oh = (h + 2 * padding - kh) // stride + 1
    ow = (w + 2 * padding - kw) // stride + 1
    cols = []
    for ki in range(kh):
        for kj in range(kw):
            cols.append(
                xp[:, ki:ki + stride * oh:stride, kj:kj + stride * ow:stride, :])
    patches = jnp.concatenate(cols, axis=-1)  # (N, OH, OW, Kh*Kw*Cin)
    return patches.reshape(n * oh * ow, kh * kw * cin), oh, ow


@functools.partial(jax.jit, static_argnames=("stride", "padding"))
def cnn_block_forward(x_nchw, conv_w, gamma, beta, *, stride=1, padding=1):
    """x_nchw: (N, Cin, H, W), conv_w: (Cout, Cin, Kh, Kw) -> (N, Cout, OH, OW)."""
    n, cin, h, w = x_nchw.shape
    cout, _, kh, kw = conv_w.shape

    x_nhwc = jnp.transpose(x_nchw, (0, 2, 3, 1)).astype(jnp.float32)
    patches, oh, ow = _im2col_nhwc(x_nhwc, kh, kw, stride, padding)
    w_mat = jnp.transpose(conv_w, (2, 3, 1, 0)).reshape(kh * kw * cin, cout)

    m, kdim = patches.shape

    # ---- tiling ----
    tm = min(256, _round_up(m, 8))          # M tile (multiple of 8 sublanes)
    m_pad = _round_up(m, tm)
    n_mt = m_pad // tm

    if kdim <= 512:                          # single K block for shallow layers
        tk, kdim_pad = kdim, kdim
    else:                                    # K reduction axis for deep layers
        tk = 512
        kdim_pad = _round_up(kdim, tk)
    n_kt = kdim_pad // tk

    cpad = _round_up(cout, 128)              # lane-dense output / weight N dim

    # ---- pad + bf16 cast (MXU native path; accumulation stays f32) ----
    # Zero-padded rows/cols contribute exactly 0 to conv, sum and sumsq.
    patches_p = jnp.pad(patches, ((0, m_pad - m), (0, kdim_pad - kdim))
                        ).astype(jnp.bfloat16)
    w_p = jnp.pad(w_mat, ((0, kdim_pad - kdim), (0, cpad - cout))
                  ).astype(jnp.bfloat16)
    gamma_p = jnp.pad(gamma.astype(jnp.float32), (0, cpad - cout))
    beta_p = jnp.pad(beta.astype(jnp.float32), (0, cpad - cout))

    cost1 = pl.CostEstimate(
        flops=2 * m_pad * kdim_pad * cpad,
        transcendentals=0,
        bytes_accessed=(m_pad * kdim_pad * 2 + kdim_pad * cpad * 2
                        + m_pad * cpad * 4 + n_mt * 8 * cpad * 4),
    )

    # ---- pass 1: tiled conv matmul + per-tile channel stats ----
    y_pad, stats = pl.pallas_call(
        _conv_stats_kernel,
        out_shape=(jax.ShapeDtypeStruct((m_pad, cpad), jnp.float32),
                   jax.ShapeDtypeStruct((n_mt * 8, cpad), jnp.float32)),
        grid_spec=pltpu.PrefetchScalarGridSpec(
            num_scalar_prefetch=0,
            grid=(n_mt, n_kt),
            in_specs=[
                pl.BlockSpec((tm, tk), lambda i, k: (i, k)),
                pl.BlockSpec((tk, cpad), lambda i, k: (k, 0)),
            ],
            out_specs=[
                pl.BlockSpec((tm, cpad), lambda i, k: (i, 0)),
                pl.BlockSpec((8, cpad), lambda i, k: (i, 0)),
            ],
            scratch_shapes=[pltpu.VMEM((tm, cpad), jnp.float32)],
        ),
        compiler_params=pltpu.CompilerParams(
            dimension_semantics=("parallel", "arbitrary")),
        cost_estimate=cost1,
    )(patches_p, w_p)

    # ---- tiny global reduction of partials + BN scale/shift (plain JAX) ----
    stats3 = stats.reshape(n_mt, 8, cpad)
    ch_sum = jnp.sum(stats3[:, 0, :], axis=0)
    ch_sumsq = jnp.sum(stats3[:, 1, :], axis=0)
    mean = ch_sum / m                                     # divide by REAL m
    var = jnp.maximum(ch_sumsq / m - mean * mean, 0.0)    # biased (train-mode BN)
    scale = gamma_p * lax.rsqrt(var + BN_EPS)
    shift = beta_p - mean * scale

    # ---- pass 2: normalize + LeakyReLU, fully parallel over M tiles ----
    out_pad = pl.pallas_call(
        _bn_lrelu_kernel,
        out_shape=jax.ShapeDtypeStruct((m_pad, cpad), jnp.float32),
        grid_spec=pltpu.PrefetchScalarGridSpec(
            num_scalar_prefetch=0,
            grid=(n_mt,),
            in_specs=[
                pl.BlockSpec((tm, cpad), lambda i: (i, 0)),
                pl.BlockSpec((1, cpad), lambda i: (0, 0)),
                pl.BlockSpec((1, cpad), lambda i: (0, 0)),
            ],
            out_specs=pl.BlockSpec((tm, cpad), lambda i: (i, 0)),
        ),
        compiler_params=pltpu.CompilerParams(
            dimension_semantics=("parallel",)),
        cost_estimate=pl.CostEstimate(
            flops=3 * m_pad * cpad,
            transcendentals=0,
            bytes_accessed=2 * m_pad * cpad * 4 + 2 * cpad * 4),
    )(y_pad, scale.reshape(1, cpad), shift.reshape(1, cpad))

    # ---- glue: slice off padding, back to NCHW ----
    out = out_pad[:m, :cout].reshape(n, oh, ow, cout)
    return jnp.transpose(out, (0, 3, 1, 2))


# ---------------------------------------------------------------------------
# Pure-JAX reference (PyTorch Conv2d(bias=False) + BatchNorm2d(train) + LeakyReLU)
# ---------------------------------------------------------------------------
def _reference(x_nchw, conv_w, gamma, beta, *, stride=1, padding=1):
    y = lax.conv_general_dilated(
        x_nchw.astype(jnp.float32), conv_w.astype(jnp.float32),
        window_strides=(stride, stride),
        padding=[(padding, padding), (padding, padding)],
        dimension_numbers=("NCHW", "OIHW", "NCHW"),
    )
    mean = jnp.mean(y, axis=(0, 2, 3), keepdims=True)
    var = jnp.mean((y - mean) ** 2, axis=(0, 2, 3), keepdims=True)
    z = (y - mean) * lax.rsqrt(var + BN_EPS)
    z = z * gamma.reshape(1, -1, 1, 1) + beta.reshape(1, -1, 1, 1)
    return jnp.where(z > 0, z, LEAKY_SLOPE * z)


if __name__ == "__main__":
    # Small CNNBlock-consistent shapes: Conv2d(4 -> 8, kernel=3, stride=1, pad=1).
    N, CIN, H, W = 2, 4, 16, 16
    COUT, K = 8, 3

    key = jax.random.PRNGKey(0)
    kx, kw = jax.random.split(key)
    x = jax.random.normal(kx, (N, CIN, H, W), dtype=jnp.float32)
    conv_w = 0.1 * jax.random.normal(kw, (COUT, CIN, K, K), dtype=jnp.float32)
    gamma = jnp.ones((COUT,), jnp.float32)   # nn.BatchNorm2d default weight
    beta = jnp.zeros((COUT,), jnp.float32)   # nn.BatchNorm2d default bias

    out = cnn_block_forward(x, conv_w, gamma, beta, stride=1, padding=1)
    out = jax.block_until_ready(out)

    ref = jax.block_until_ready(
        _reference(x, conv_w, gamma, beta, stride=1, padding=1))
    # Tolerance loosened for the bf16 matmul inputs (f32 accumulation kept).
    np.testing.assert_allclose(np.asarray(out), np.asarray(ref),
                               rtol=2e-2, atol=2e-2)

    print("KERNEL_OK")
</pallas_src>

<mosaic_0001>
module attributes {stable_mosaic.version = 11 : i64} {
  func.func @_conv_stats_kernel(%arg0: i32, %arg1: i32, %arg2: memref<256x36xbf16, #tpu.memory_space<vmem>>, %arg3: memref<36x128xbf16, #tpu.memory_space<vmem>>, %arg4: memref<256x128xf32, #tpu.memory_space<vmem>>, %arg5: memref<8x128xf32, #tpu.memory_space<vmem>>, %arg6: memref<256x128xf32, #tpu.memory_space<vmem>>) attributes {dimension_semantics = [#tpu.dimension_semantics<parallel>, #tpu.dimension_semantics<arbitrary>], iteration_bounds = array<i64: 2, 1>, scalar_prefetch = 0 : i64, scratch_operands = 1 : i64, tpu.core_type = #tpu.core_type<tc>, window_params = [{transform_indices = @transform_0, window_bounds = array<i64: 256, 36>}, {transform_indices = @transform_1, window_bounds = array<i64: 36, 128>}, {transform_indices = @transform_2, window_bounds = array<i64: 256, 128>}, {transform_indices = @transform_3, window_bounds = array<i64: 8, 128>}]} {
    %c0_i32 = arith.constant 0 : i32
    %0 = arith.cmpi eq, %arg1, %c0_i32 : i32
    %1 = arith.extui %0 : i1 to i32
    %c0_i32_0 = arith.constant 0 : i32
    %2 = arith.cmpi ne, %1, %c0_i32_0 : i32
    scf.if %2 {
      %cst_10 = arith.constant 0.000000e+00 : f32
      %12 = vector.broadcast %cst_10 : f32 to vector<256x128xf32>
      %c0_11 = arith.constant 0 : index
      %c0_12 = arith.constant 0 : index
      %13 = vector.load %arg6[%c0_11, %c0_12] : memref<256x128xf32, #tpu.memory_space<vmem>>, vector<256x128xf32>
      tpu.vector_store %arg6[%c0_11, %c0_12], %12 {strides = array<i32>} : memref<256x128xf32, #tpu.memory_space<vmem>>, vector<256x128xf32>,
    } else {
    }
    %c0 = arith.constant 0 : index
    %c0_1 = arith.constant 0 : index
    %3 = vector.load %arg6[%c0, %c0_1] : memref<256x128xf32, #tpu.memory_space<vmem>>, vector<256x128xf32>
    %c0_2 = arith.constant 0 : index
    %c0_3 = arith.constant 0 : index
    %4 = vector.load %arg2[%c0_2, %c0_3] : memref<256x36xbf16, #tpu.memory_space<vmem>>, vector<256x36xbf16>
    %c0_4 = arith.constant 0 : index
    %c0_5 = arith.constant 0 : index
    %5 = vector.load %arg3[%c0_4, %c0_5] : memref<36x128xbf16, #tpu.memory_space<vmem>>, vector<36x128xbf16>
    %cst = arith.constant dense<0.000000e+00> : vector<256x128xf32>
    %6 = tpu.matmul %4, %5, %cst {dimension_numbers = #tpu.dot_dimension_numbers<[1], [0], [0], [1], [0, 0, 1, 1], [], []>} : vector<256x36xbf16>, vector<36x128xbf16>, vector<256x128xf32> -> vector<256x128xf32>
    %7 = arith.addf %3, %6 : vector<256x128xf32>
    %c0_6 = arith.constant 0 : index
    %c0_7 = arith.constant 0 : index
    %8 = vector.load %arg6[%c0_6, %c0_7] : memref<256x128xf32, #tpu.memory_space<vmem>>, vector<256x128xf32>
    tpu.vector_store %arg6[%c0_6, %c0_7], %7 {strides = array<i32>} : memref<256x128xf32, #tpu.memory_space<vmem>>, vector<256x128xf32>,
    %c0_i32_8 = arith.constant 0 : i32
    %9 = arith.cmpi eq, %arg1, %c0_i32_8 : i32
    %10 = arith.extui %9 : i1 to i32
    %c0_i32_9 = arith.constant 0 : i32
    %11 = arith.cmpi ne, %10, %c0_i32_9 : i32
    scf.if %11 {
      %c0_10 = arith.constant 0 : index
      %c0_11 = arith.constant 0 : index
      %12 = vector.load %arg6[%c0_10, %c0_11] : memref<256x128xf32, #tpu.memory_space<vmem>>, vector<256x128xf32>
      %c0_12 = arith.constant 0 : index
      %c0_13 = arith.constant 0 : index
      %13 = vector.load %arg4[%c0_12, %c0_13] : memref<256x128xf32, #tpu.memory_space<vmem>>, vector<256x128xf32>
      tpu.vector_store %arg4[%c0_12, %c0_13], %12 {strides = array<i32>} : memref<256x128xf32, #tpu.memory_space<vmem>>, vector<256x128xf32>,
      %cst_14 = arith.constant dense<0.000000e+00> : vector<128xf32>
      %14 = vector.multi_reduction <add>, %12, %cst_14 [0] : vector<256x128xf32> to vector<128xf32>
      %15 = vector.shape_cast %14 : vector<128xf32> to vector<1x128xf32>
      %16 = arith.mulf %12, %12 : vector<256x128xf32>
      %cst_15 = arith.constant dense<0.000000e+00> : vector<128xf32>
      %17 = vector.multi_reduction <add>, %16, %cst_15 [0] : vector<256x128xf32> to vector<128xf32>
      %18 = vector.shape_cast %17 : vector<128xf32> to vector<1x128xf32>
      %19 = tpu.iota {dimensions = array<i32: 0>} : vector<8x128xi32>
      %c0_i32_16 = arith.constant 0 : i32
      %20 = vector.broadcast %c0_i32_16 : i32 to vector<8x128xi32>
      %21 = arith.cmpi eq, %19, %20 : vector<8x128xi32>
      %22 = vector.shape_cast %15 : vector<1x128xf32> to vector<1x128xf32>
      %23 = vector.broadcast %22 : vector<1x128xf32> to vector<8x128xf32>
      %c1_i32 = arith.constant 1 : i32
      %24 = vector.broadcast %c1_i32 : i32 to vector<8x128xi32>
      %25 = arith.cmpi eq, %19, %24 : vector<8x128xi32>
      %26 = vector.shape_cast %18 : vector<1x128xf32> to vector<1x128xf32>
      %27 = vector.broadcast %26 : vector<1x128xf32> to vector<8x128xf32>
      %cst_17 = arith.constant 0.000000e+00 : f32
      %28 = vector.broadcast %cst_17 : f32 to vector<8x128xf32>
      %29 = arith.select %25, %27, %28 : vector<8x128xi1>, vector<8x128xf32>
      %30 = arith.select %21, %23, %29 : vector<8x128xi1>, vector<8x128xf32>
      %c0_18 = arith.constant 0 : index
      %c0_19 = arith.constant 0 : index
      %31 = vector.load %arg5[%c0_18, %c0_19] : memref<8x128xf32, #tpu.memory_space<vmem>>, vector<8x128xf32>
      tpu.vector_store %arg5[%c0_18, %c0_19], %30 {strides = array<i32>} : memref<8x128xf32, #tpu.memory_space<vmem>>, vector<8x128xf32>,
    } else {
    }
    return
  }
  func.func @transform_0(%arg0: i32, %arg1: i32) -> (i32, i32) {
    %c0_i32 = arith.constant 0 : i32
    return %arg0, %arg1 : i32, i32
  }
  func.func @transform_1(%arg0: i32, %arg1: i32) -> (i32, i32) {
    %c0_i32 = arith.constant 0 : i32
    %c0_i32_0 = arith.constant 0 : i32
    return %arg1, %c0_i32 : i32, i32
  }
  func.func @transform_2(%arg0: i32, %arg1: i32) -> (i32, i32) {
    %c0_i32 = arith.constant 0 : i32
    %c0_i32_0 = arith.constant 0 : i32
    return %arg0, %c0_i32 : i32, i32
  }
  func.func @transform_3(%arg0: i32, %arg1: i32) -> (i32, i32) {
    %c0_i32 = arith.constant 0 : i32
    %c0_i32_0 = arith.constant 0 : i32
    return %arg0, %c0_i32 : i32, i32
  }
}

module attributes {stable_mosaic.version = 11 : i64} {
  func.func @_bn_lrelu_kernel(%arg0: i32, %arg1: memref<256x128xf32, #tpu.memory_space<vmem>>, %arg2: memref<1x128xf32, #tpu.memory_space<vmem>>, %arg3: memref<1x128xf32, #tpu.memory_space<vmem>>, %arg4: memref<256x128xf32, #tpu.memory_space<vmem>>) attributes {dimension_semantics = [#tpu.dimension_semantics<parallel>], iteration_bounds = array<i64: 2>, scalar_prefetch = 0 : i64, scratch_operands = 0 : i64, tpu.core_type = #tpu.core_type<tc>, window_params = [{transform_indices = @transform_0, window_bounds = array<i64: 256, 128>}, {pipeline_mode = #tpu.pipeline_mode<synchronous>, transform_indices = @transform_1, window_bounds = array<i64: 1, 128>}, {pipeline_mode = #tpu.pipeline_mode<synchronous>, transform_indices = @transform_2, window_bounds = array<i64: 1, 128>}, {transform_indices = @transform_3, window_bounds = array<i64: 256, 128>}]} {
    %c0 = arith.constant 0 : index
    %c0_0 = arith.constant 0 : index
    %0 = vector.load %arg1[%c0, %c0_0] : memref<256x128xf32, #tpu.memory_space<vmem>>, vector<256x128xf32>
    %c0_1 = arith.constant 0 : index
    %c0_2 = arith.constant 0 : index
    %1 = vector.load %arg2[%c0_1, %c0_2] : memref<1x128xf32, #tpu.memory_space<vmem>>, vector<1x128xf32>
    %2 = vector.broadcast %1 : vector<1x128xf32> to vector<256x128xf32>
    %3 = arith.mulf %0, %2 : vector<256x128xf32>
    %c0_3 = arith.constant 0 : index
    %c0_4 = arith.constant 0 : index
    %4 = vector.load %arg3[%c0_3, %c0_4] : memref<1x128xf32, #tpu.memory_space<vmem>>, vector<1x128xf32>
    %5 = vector.broadcast %4 : vector<1x128xf32> to vector<256x128xf32>
    %6 = arith.addf %3, %5 : vector<256x128xf32>
    %cst = arith.constant 0.000000e+00 : f32
    %7 = vector.broadcast %cst : f32 to vector<256x128xf32>
    %8 = arith.cmpf ogt, %6, %7 : vector<256x128xf32>
    %cst_5 = arith.constant 1.000000e-01 : f32
    %9 = vector.broadcast %cst_5 : f32 to vector<256x128xf32>
    %10 = arith.mulf %9, %6 : vector<256x128xf32>
    %11 = arith.select %8, %6, %10 : vector<256x128xi1>, vector<256x128xf32>
    %c0_6 = arith.constant 0 : index
    %c0_7 = arith.constant 0 : index
    %12 = vector.load %arg4[%c0_6, %c0_7] : memref<256x128xf32, #tpu.memory_space<vmem>>, vector<256x128xf32>
    tpu.vector_store %arg4[%c0_6, %c0_7], %11 {strides = array<i32>} : memref<256x128xf32, #tpu.memory_space<vmem>>, vector<256x128xf32>,
    return
  }
  func.func @transform_0(%arg0: i32) -> (i32, i32) {
    %c0_i32 = arith.constant 0 : i32
    %c0_i32_0 = arith.constant 0 : i32
    return %arg0, %c0_i32 : i32, i32
  }
  func.func @transform_1(%arg0: i32) -> (i32, i32) {
    %c0_i32 = arith.constant 0 : i32
    %c0_i32_0 = arith.constant 0 : i32
    %c0_i32_1 = arith.constant 0 : i32
    return %c0_i32, %c0_i32_0 : i32, i32
  }
  func.func @transform_2(%arg0: i32) -> (i32, i32) {
    %c0_i32 = arith.constant 0 : i32
    %c0_i32_0 = arith.constant 0 : i32
    %c0_i32_1 = arith.constant 0 : i32
    return %c0_i32, %c0_i32_0 : i32, i32
  }
  func.func @transform_3(%arg0: i32) -> (i32, i32) {
    %c0_i32 = arith.constant 0 : i32
    %c0_i32_0 = arith.constant 0 : i32
    return %arg0, %c0_i32 : i32, i32
  }
}

</mosaic_0001>

<bundles_post_ra>
// kernel: cnn_block_forward.3
= control target key start
LH: loop header
LB: loop body
LE: loop exit
PB: predicated region body
PF: predicated region fallthrough
CT: control target
= control target key end

     0   :  { %s511_s12 = smov 0   ;;  %s674_s0 = inlined_call_operand.vmem [shape: f32[512,128], index: 0, kind: input, shape index: {}]   ;;  %s675_s1 = inlined_call_operand.vmem [shape: f32[1,128], index: 1, kind: input, shape index: {}]   ;;  %s676_s2 = inlined_call_operand.vmem [shape: f32[1,128], index: 2, kind: input, shape index: {}]   ;;  %s677_s3 = inlined_call_operand.vmem [shape: f32[512,128], index: 3, kind: output, shape index: {}]  }
   0x1 LB: > { %s462_s13 = sadd.s32 4294967295, %s489_s12   ;;  %p466_p0 = scmp.ge.s32.totalorder %s489_s12, 1  ;;  %s489_s12 = sphi %s511_s12, %s13_s12  }
   0x2   : > { %p138_p1 = scmp.lt.s32.totalorder %s489_s12, 3 }
   0x4   : > { %p139_p2 = pnand %p466_p0, %p138_p1 }
   0x5   : > { %s467_s14 = sshll.u32 (!%p139_p2), %s462_s13, 5 }
   0x6   : > { %142 = sbr.rel (%p139_p2) target bundleno = 59 (0x3b), region = 32  ;;  %p163_p3 = scmp.lt.s32.totalorder (!%p139_p2), %s467_s14, 63 }
   0xb   : > { %s679_s14 = smov (!%p163_p3, %s467_s14), 63  ;;  %v524_v0 = vld [vmem:[%s675_s1] ss:$0 sm:$0xff] }
   0xc   : > { %s468_s17 = sshll.u32 %s679_s14, 3  ;;  %v535_v1 = vld [vmem:[%s676_s2] ss:$0 sm:$0xff] }
   0xd   : > { %s530_s20 = scalar_lea.vmem %s674_s0, %s468_s17  ;;  %s563_s25 = scalar_lea.vmem %s677_s3, %s468_s17 }
   0xe   : > { %v174_v2 = vld [vmem:[%s530_s20] sm:$0xff]  ;;  %v175_v3 = vld [vmem:[%s530_s20 + $0x8] sm:$0xff]  ;;  %v176_v4 = vld [vmem:[%s530_s20 + $0x10] sm:$0xff] }
   0xf   : > { %v210_v5 = vmul.f32 %v524_v0, %v174_v2  ;;  %v211_v6 = vmul.f32 %v524_v0, %v175_v3  ;;  %v212_v7 = vmul.f32 %v524_v0, %v176_v4  ;;  %v177_v8 = vld [vmem:[%s530_s20 + $0x18] sm:$0xff]  ;;  %v178_v9 = vld [vmem:[%s530_s20 + $0x20] sm:$0xff]  ;;  %v179_v10 = vld [vmem:[%s530_s20 + $0x28] sm:$0xff] }
  0x10   : > { %v213_v11 = vmul.f32 %v524_v0, %v177_v8  ;;  %v214_v12 = vmul.f32 %v524_v0, %v178_v9  ;;  %v215_v13 = vmul.f32 %v524_v0, %v179_v10  ;;  %v180_v14 = vld [vmem:[%s530_s20 + $0x30] sm:$0xff]  ;;  %v181_v15 = vld [vmem:[%s530_s20 + $0x38] sm:$0xff]  ;;  %v182_v24 = vld [vmem:[%s530_s20 + $0x40] sm:$0xff] }
  0x11   : > { %v246_v16 = vadd.f32 %v535_v1, %v210_v5  ;;  %v247_v17 = vadd.f32 %v535_v1, %v211_v6  ;;  %v248_v18 = vadd.f32 %v535_v1, %v212_v7  ;;  %v216_v19 = vmul.f32 %v524_v0, %v180_v14  ;;  %v183_v32 = vld [vmem:[%s530_s20 + $0x48] sm:$0xff]  ;;  %v184_v33 = vld [vmem:[%s530_s20 + $0x50] sm:$0xff]  ;;  %v185_v34 = vld [vmem:[%s530_s20 + $0x58] sm:$0xff] }
  0x12   : > { %v249_v20 = vadd.f32 %v535_v1, %v213_v11  ;;  %v250_v21 = vadd.f32 %v535_v1, %v214_v12  ;;  %v251_v22 = vadd.f32 %v535_v1, %v215_v13  ;;  %v217_v23 = vmul.f32 %v524_v0, %v181_v15  ;;  %v186_v46 = vld [vmem:[%s530_s20 + $0x60] sm:$0xff]  ;;  %v187_v53 = vld [vmem:[%s530_s20 + $0x68] sm:$0xff]  ;;  %v188_v57 = vld [vmem:[%s530_s20 + $0x70] sm:$0xff] }
  0x13   : > { %vm278_vm0 = vcmp.gt.f32.partialorder %v246_v16, 0.0  ;;  %v310_v25 = vmul.f32 0.1, %v246_v16  ;;  %vm279_vm1 = vcmp.gt.f32.partialorder %v247_v17, 0.0  ;;  %v311_v26 = vmul.f32 0.1, %v247_v17 }
  0x14   : > { %vm280_vm2 = vcmp.gt.f32.partialorder %v248_v18, 0.0  ;;  %v312_v27 = vmul.f32 0.1, %v248_v18  ;;  %vm281_vm3 = vcmp.gt.f32.partialorder %v249_v20, 0.0  ;;  %v313_v28 = vmul.f32 0.1, %v249_v20 }
  0x15   : > { %v342_v29 = vsel %vm278_vm0, %v246_v16, %v310_v25  ;;  %v343_v30 = vsel %vm279_vm1, %v247_v17, %v311_v26  ;;  %vm282_vm4 = vcmp.gt.f32.partialorder %v250_v21, 0.0  ;;  %v314_v31 = vmul.f32 0.1, %v250_v21  ;;  %v189_v58 = vld [vmem:[%s530_s20 + $0x78] sm:$0xff]  ;;  %v190_v61 = vld [vmem:[%s530_s20 + $0x80] sm:$0xff]  ;;  %v191_v7 = vld [vmem:[%s530_s20 + $0x88] sm:$0xff] }
  0x16   : > { %374 = vst [vmem:[%s563_s25] sm:$0xff] %v342_v29  ;;  %v344_v35 = vsel %vm280_vm2, %v248_v18, %v312_v27  ;;  %v345_v36 = vsel %vm281_vm3, %v249_v20, %v313_v28  ;;  %vm283_vm5 = vcmp.gt.f32.partialorder %v251_v22, 0.0  ;;  %v315_v37 = vmul.f32 0.1, %v251_v22  ;;  %v192_v8 = vld [vmem:[%s530_s20 + $0x90] sm:$0xff]  ;;  %v194_v29 = vld [vmem:[%s530_s20 + $0xa0] sm:$0xff] }
  0x17   : > { %375 = vst [vmem:[%s563_s25 + $0x8] sm:$0xff] %v343_v30  ;;  %v346_v38 = vsel %vm282_vm4, %v250_v21, %v314_v31  ;;  %v252_v39 = vadd.f32 %v535_v1, %v216_v19  ;;  %v253_v40 = vadd.f32 %v535_v1, %v217_v23  ;;  %v218_v41 = vmul.f32 %v524_v0, %v182_v24  ;;  %v195_v30 = vld [vmem:[%s530_s20 + $0xa8] sm:$0xff]  ;;  %v196_v31 = vld [vmem:[%s530_s20 + $0xb0] sm:$0xff] }
  0x18   : > { %376 = vst [vmem:[%s563_s25 + $0x10] sm:$0xff] %v344_v35  ;;  %v347_v42 = vsel %vm283_vm5, %v251_v22, %v315_v37  ;;  %v219_v43 = vmul.f32 %v524_v0, %v183_v32  ;;  %v220_v44 = vmul.f32 %v524_v0, %v184_v33  ;;  %v221_v45 = vmul.f32 %v524_v0, %v185_v34  ;;  %v193_v22 = vld [vmem:[%s530_s20 + $0x98] sm:$0xff] }
  0x19   : > { %377 = vst [vmem:[%s563_s25 + $0x18] sm:$0xff] %v345_v36  ;;  %vm284_vm6 = vcmp.gt.f32.partialorder %v252_v39, 0.0  ;;  %v316_v47 = vmul.f32 0.1, %v252_v39  ;;  %vm285_vm7 = vcmp.gt.f32.partialorder %v253_v40, 0.0  ;;  %v254_v48 = vadd.f32 %v535_v1, %v218_v41  ;;  %v197_v35 = vld [vmem:[%s530_s20 + $0xb8] sm:$0xff] }
  0x1a   : > { %378 = vst [vmem:[%s563_s25 + $0x20] sm:$0xff] %v346_v38  ;;  %v317_v49 = vmul.f32 0.1, %v253_v40  ;;  %v255_v50 = vadd.f32 %v535_v1, %v219_v43  ;;  %v256_v51 = vadd.f32 %v535_v1, %v220_v44  ;;  %v257_v52 = vadd.f32 %v535_v1, %v221_v45  ;;  %v198_v36 = vld [vmem:[%s530_s20 + $0xc0] sm:$0xff] }
  0x1b   : > { %379 = vst [vmem:[%s563_s25 + $0x28] sm:$0xff] %v347_v42  ;;  %v348_v54 = vsel %vm284_vm6, %v252_v39, %v316_v47  ;;  %vm286_vm8 = vcmp.gt.f32.partialorder %v254_v48, 0.0  ;;  %v318_v55 = vmul.f32 0.1, %v254_v48  ;;  %v222_v56 = vmul.f32 %v524_v0, %v186_v46 }
  0x1c   : > { %380 = vst [vmem:[%s563_s25 + $0x30] sm:$0xff] %v348_v54  ;;  %v349_v59 = vsel %vm285_vm7, %v253_v40, %v317_v49  ;;  %vm287_vm9 = vcmp.gt.f32.partialorder %v255_v50, 0.0  ;;  %v319_v60 = vmul.f32 0.1, %v255_v50  ;;  %vm288_vm10 = vcmp.gt.f32.partialorder %v256_v51, 0.0  ;;  %v199_v40 = vld [vmem:[%s530_s20 + $0xc8] sm:$0xff] }
  0x1d   : > { %381 = vst [vmem:[%s563_s25 + $0x38] sm:$0xff] %v349_v59  ;;  %v350_v62 = vsel %vm286_vm8, %v254_v48, %v318_v55  ;;  %v320_v63 = vmul.f32 0.1, %v256_v51  ;;  %vm289_vm11 = vcmp.gt.f32.partialorder %v257_v52, 0.0  ;;  %v321_v2 = vmul.f32 0.1, %v257_v52 }
  0x1e   : > { %382 = vst [vmem:[%s563_s25 + $0x40] sm:$0xff] %v350_v62  ;;  %v351_v3 = vsel %vm287_vm9, %v255_v50, %v319_v60  ;;  %v258_v4 = vadd.f32 %v535_v1, %v222_v56  ;;  %v223_v5 = vmul.f32 %v524_v0, %v187_v53  ;;  %v224_v6 = vmul.f32 %v524_v0, %v188_v57  ;;  %v200_v56 = vld [vmem:[%s530_s20 + $0xd0] sm:$0xff]  ;;  %v201_v57 = vld [vmem:[%s530_s20 + $0xd8] sm:$0xff]  ;;  %v202_v62 = vld [vmem:[%s530_s20 + $0xe0] sm:$0xff] }
  0x1f   : > { %383 = vst [vmem:[%s563_s25 + $0x48] sm:$0xff] %v351_v3  ;;  %v352_v9 = vsel %vm288_vm10, %v256_v51, %v320_v63  ;;  %v353_v10 = vsel %vm289_vm11, %v257_v52, %v321_v2  ;;  %v225_v11 = vmul.f32 %v524_v0, %v189_v58  ;;  %v226_v12 = vmul.f32 %v524_v0, %v190_v61  ;;  %v203_v63 = vld [vmem:[%s530_s20 + $0xe8] sm:$0xff] }
  0x20   : > { %384 = vst [vmem:[%s563_s25 + $0x50] sm:$0xff] %v352_v9  ;;  %vm290_vm12 = vcmp.gt.f32.partialorder %v258_v4, 0.0  ;;  %v322_v13 = vmul.f32 0.1, %v258_v4  ;;  %v259_v14 = vadd.f32 %v535_v1, %v223_v5  ;;  %v260_v15 = vadd.f32 %v535_v1, %v224_v6  ;;  %v204_v9 = vld [vmem:[%s530_s20 + $0xf0] sm:$0xff] }
  0x21   : > { %385 = vst [vmem:[%s563_s25 + $0x58] sm:$0xff] %v353_v10  ;;  %v261_v16 = vadd.f32 %v535_v1, %v225_v11  ;;  %v262_v17 = vadd.f32 %v535_v1, %v226_v12  ;;  %v227_v18 = vmul.f32 %v524_v0, %v191_v7  ;;  %v228_v19 = vmul.f32 %v524_v0, %v192_v8 }
  0x22   : > { %v354_v20 = vsel %vm290_vm12, %v258_v4, %v322_v13  ;;  %vm291_vm13 = vcmp.gt.f32.partialorder %v259_v14, 0.0  ;;  %v323_v21 = vmul.f32 0.1, %v259_v14  ;;  %vm292_vm14 = vcmp.gt.f32.partialorder %v260_v15, 0.0 }
  0x23   : > { %386 = vst [vmem:[%s563_s25 + $0x60] sm:$0xff] %v354_v20  ;;  %v324_v23 = vmul.f32 0.1, %v260_v15  ;;  %vm293_vm15 = vcmp.gt.f32.partialorder %v261_v16, 0.0  ;;  %v325_v24 = vmul.f32 0.1, %v261_v16  ;;  %v263_v25 = vadd.f32 %v535_v1, %v227_v18 }
  0x24   : > { %v355_v26 = vsel %vm291_vm13, %v259_v14, %v323_v21  ;;  %vm294_vm0 = vcmp.gt.f32.partialorder %v262_v17, 0.0  ;;  %v326_v27 = vmul.f32 0.1, %v262_v17  ;;  %v264_v28 = vadd.f32 %v535_v1, %v228_v19  ;;  %v205_v14 = vld [vmem:[%s530_s20 + $0xf8] sm:$0xff] }
  0x25   : > { %387 = vst [vmem:[%s563_s25 + $0x68] sm:$0xff] %v355_v26  ;;  %v356_v32 = vsel %vm292_vm14, %v260_v15, %v324_v23  ;;  %v357_v33 = vsel %vm293_vm15, %v261_v16, %v325_v24  ;;  %vm295_vm1 = vcmp.gt.f32.partialorder %v263_v25, 0.0  ;;  %v327_v34 = vmul.f32 0.1, %v263_v25 }
  0x26   : > { %388 = vst [vmem:[%s563_s25 + $0x70] sm:$0xff] %v356_v32  ;;  %v358_v37 = vsel %vm294_vm0, %v262_v17, %v326_v27  ;;  %vm296_vm2 = vcmp.gt.f32.partialorder %v264_v28, 0.0  ;;  %v328_v38 = vmul.f32 0.1, %v264_v28  ;;  %v229_v39 = vmul.f32 %v524_v0, %v193_v22 }
  0x27   : > { %389 = vst [vmem:[%s563_s25 + $0x78] sm:$0xff] %v357_v33  ;;  %v359_v41 = vsel %vm295_vm1, %v263_v25, %v327_v34  ;;  %v230_v42 = vmul.f32 %v524_v0, %v194_v29  ;;  %v231_v43 = vmul.f32 %v524_v0, %v195_v30  ;;  %v232_v44 = vmul.f32 %v524_v0, %v196_v31 }
  0x28   : > { %390 = vst [vmem:[%s563_s25 + $0x80] sm:$0xff] %v358_v37  ;;  %v360_v45 = vsel %vm296_vm2, %v264_v28, %v328_v38  ;;  %v265_v46 = vadd.f32 %v535_v1, %v229_v39  ;;  %v233_v47 = vmul.f32 %v524_v0, %v197_v35  ;;  %v234_v48 = vmul.f32 %v524_v0, %v198_v36 }
  0x29   : > { %391 = vst [vmem:[%s563_s25 + $0x88] sm:$0xff] %v359_v41  ;;  %v266_v49 = vadd.f32 %v535_v1, %v230_v42  ;;  %v267_v50 = vadd.f32 %v535_v1, %v231_v43  ;;  %v268_v51 = vadd.f32 %v535_v1, %v232_v44  ;;  %v235_v52 = vmul.f32 %v524_v0, %v199_v40 }
  0x2a   : > { %392 = vst [vmem:[%s563_s25 + $0x90] sm:$0xff] %v360_v45  ;;  %vm297_vm3 = vcmp.gt.f32.partialorder %v265_v46, 0.0  ;;  %v329_v53 = vmul.f32 0.1, %v265_v46  ;;  %v269_v54 = vadd.f32 %v535_v1, %v233_v47  ;;  %v270_v55 = vadd.f32 %v535_v1, %v234_v48 }
  0x2b   : > { %vm298_vm4 = vcmp.gt.f32.partialorder %v266_v49, 0.0  ;;  %v330_v58 = vmul.f32 0.1, %v266_v49  ;;  %vm299_vm5 = vcmp.gt.f32.partialorder %v267_v50, 0.0  ;;  %v331_v59 = vmul.f32 0.1, %v267_v50 }
  0x2c   : > { %v361_v60 = vsel %vm297_vm3, %v265_v46, %v329_v53  ;;  %vm300_vm6 = vcmp.gt.f32.partialorder %v268_v51, 0.0  ;;  %v332_v61 = vmul.f32 0.1, %v268_v51  ;;  %vm301_vm7 = vcmp.gt.f32.partialorder %v269_v54, 0.0 }
  0x2d   : > { %393 = vst [vmem:[%s563_s25 + $0x98] sm:$0xff] %v361_v60  ;;  %v362_v2 = vsel %vm298_vm4, %v266_v49, %v330_v58  ;;  %v363_v3 = vsel %vm299_vm5, %v267_v50, %v331_v59  ;;  %v333_v4 = vmul.f32 0.1, %v269_v54  ;;  %vm302_vm8 = vcmp.gt.f32.partialorder %v270_v55, 0.0 }
  0x2e   : > { %394 = vst [vmem:[%s563_s25 + $0xa0] sm:$0xff] %v362_v2  ;;  %v364_v5 = vsel %vm300_vm6, %v268_v51, %v332_v61  ;;  %v334_v6 = vmul.f32 0.1, %v270_v55  ;;  %v271_v7 = vadd.f32 %v535_v1, %v235_v52  ;;  %v236_v8 = vmul.f32 %v524_v0, %v200_v56 }
  0x2f   : > { %395 = vst [vmem:[%s563_s25 + $0xa8] sm:$0xff] %v363_v3  ;;  %v365_v10 = vsel %vm301_vm7, %v269_v54, %v333_v4  ;;  %v237_v11 = vmul.f32 %v524_v0, %v201_v57  ;;  %v238_v12 = vmul.f32 %v524_v0, %v202_v62  ;;  %v239_v13 = vmul.f32 %v524_v0, %v203_v63 }
  0x30   : > { %396 = vst [vmem:[%s563_s25 + $0xb0] sm:$0xff] %v364_v5  ;;  %v366_v15 = vsel %vm302_vm8, %v270_v55, %v334_v6  ;;  %vm303_vm9 = vcmp.gt.f32.partialorder %v271_v7, 0.0  ;;  %v335_v16 = vmul.f32 0.1, %v271_v7  ;;  %v272_v17 = vadd.f32 %v535_v1, %v236_v8 }
  0x31   : > { %397 = vst [vmem:[%s563_s25 + $0xb8] sm:$0xff] %v365_v10  ;;  %v273_v18 = vadd.f32 %v535_v1, %v237_v11  ;;  %v274_v19 = vadd.f32 %v535_v1, %v238_v12  ;;  %v275_v20 = vadd.f32 %v535_v1, %v239_v13  ;;  %v240_v21 = vmul.f32 %v524_v0, %v204_v9 }
  0x32   : > { %398 = vst [vmem:[%s563_s25 + $0xc0] sm:$0xff] %v366_v15  ;;  %v367_v22 = vsel %vm303_vm9, %v271_v7, %v335_v16  ;;  %vm304_vm10 = vcmp.gt.f32.partialorder %v272_v17, 0.0  ;;  %v336_v23 = vmul.f32 0.1, %v272_v17  ;;  %v241_v24 = vmul.f32 %v524_v0, %v205_v14 }
  0x33   : > { %399 = vst [vmem:[%s563_s25 + $0xc8] sm:$0xff] %v367_v22  ;;  %vm305_vm11 = vcmp.gt.f32.partialorder %v273_v18, 0.0  ;;  %v337_v25 = vmul.f32 0.1, %v273_v18  ;;  %vm306_vm12 = vcmp.gt.f32.partialorder %v274_v19, 0.0  ;;  %vm307_vm13 = vcmp.gt.f32.partialorder %v275_v20, 0.0 }
  0x34   : > { %v368_v26 = vsel %vm304_vm10, %v272_v17, %v336_v23  ;;  %v338_v27 = vmul.f32 0.1, %v274_v19  ;;  %v339_v28 = vmul.f32 0.1, %v275_v20  ;;  %v276_v29 = vadd.f32 %v535_v1, %v240_v21 }
  0x35   : > { %400 = vst [vmem:[%s563_s25 + $0xd0] sm:$0xff] %v368_v26  ;;  %v369_v30 = vsel %vm305_vm11, %v273_v18, %v337_v25  ;;  %v277_v31 = vadd.f32 %v535_v1, %v241_v24 }
  0x36   : > { %401 = vst [vmem:[%s563_s25 + $0xd8] sm:$0xff] %v369_v30  ;;  %v370_v0 = vsel %vm306_vm12, %v274_v19, %v338_v27  ;;  %v371_v32 = vsel %vm307_vm13, %v275_v20, %v339_v28  ;;  %vm308_vm14 = vcmp.gt.f32.partialorder %v276_v29, 0.0  ;;  %v340_v33 = vmul.f32 0.1, %v276_v29 }
  0x37   : > { %402 = vst [vmem:[%s563_s25 + $0xe0] sm:$0xff] %v370_v0  ;;  %vm309_vm15 = vcmp.gt.f32.partialorder %v277_v31, 0.0  ;;  %v341_v34 = vmul.f32 0.1, %v277_v31 }
  0x38   : > { %403 = vst [vmem:[%s563_s25 + $0xe8] sm:$0xff] %v371_v32  ;;  %v372_v35 = vsel %vm308_vm14, %v276_v29, %v340_v33 }
  0x39   : > { %404 = vst [vmem:[%s563_s25 + $0xf0] sm:$0xff] %v372_v35  ;;  %v373_v36 = vsel %vm309_vm15, %v277_v31, %v341_v34 }
  0x3a   : > { %405 = vst [vmem:[%s563_s25 + $0xf8] sm:$0xff] %v373_v36 }
  0x3b PF: > { %s13_s12 = sadd.s32 1, %s489_s12  }
  0x3c   : > { %p10_p4 = scmp.ge.s32.totalorder %s13_s12, 4  }
  0x3e   :  { %12 = sbr.rel (!%p10_p4) target bundleno = 1 (0x1), region = 62 }

// kernel: cnn_block_forward.2
= control target key start
LH: loop header
LB: loop body
LE: loop exit
PB: predicated region body
PF: predicated region fallthrough
CT: control target
= control target key end

     0   :  { %s1127_s12 = smov 0   ;;  %s1129_s13 = smov 0   ;;  %s1363_s0 = inlined_call_operand.vmem [shape: bf16[512,36], index: 0, kind: input, shape index: {}]   ;;  %s1364_s1 = inlined_call_operand.vmem [shape: bf16[36,128], index: 1, kind: input, shape index: {}]   ;;  %s1365_s2 = inlined_call_operand.vmem [shape: f32[512,128], index: 2, kind: output, shape index: {0}]   ;;  %s1366_s3 = inlined_call_operand.vmem [shape: f32[16,128], index: 3, kind: output, shape index: {1}]  }
   0x1   :  { %s1131_s14 = smov 0  }
   0x2 LB: > { %s26_s15 = sadd.s32 1, %s1101_s13  ;;  %p936_p0 = scmp.ge.s32.totalorder %s1105_s14, 1  ;;  %s1105_s14 = sphi %s1131_s14, %s14_s14   ;;  %s1101_s13 = sphi %s1129_s13, %s1368_s13   ;;  %s1097_s12 = sphi %s1127_s12, %s1367_s12  }
   0x3   : > { %p28_p1 = scmp.ge.s32.totalorder %s26_s15, 2  ;;  %p169_p2 = scmp.lt.s32.totalorder %s1105_s14, 3 }
   0x5   : > { %s1370_s15 = smov (%p28_p1, %s26_s15), 0  ;;  %p170_p3 = pnand %p936_p0, %p169_p2 }
   0x6   : > { %s937_s18 = sshll.u32 (!%p170_p3), %s1097_s12, 5  ;;  %p226_p5 = scmp.lt.s32.totalorder (!%p170_p3), %s1097_s12, 1 }
   0x7   : > { %173 = sbr.rel (%p170_p3) target bundleno = 278 (0x116), region = 28  ;;  %p206_p4 = scmp.lt.s32.totalorder (!%p170_p3), %s937_s18, 63 }
   0xc   : > { %v335_v0 = vld [vmem:[%s1364_s1 + $0x10] sm:$0x3]  ;;  %vm480_vm0 = vcmask 1041408   ;;  %s1372_s18 = smov (!%p206_p4, %s937_s18), 63  ;;  %v1049_v4 = vld [vmem:[%s1364_s1 + $0x8] sm:$0xff]  ;;  %v1048_v5 = vld [vmem:[%s1364_s1] sm:$0xff] }
   0xd   : > { %v425_v1 = vunpack.c.l.b16 %v335_v0  ;;  %s938_s21 = sshll.u32 %s1372_s18, 2  ;;  %vm431_vm1 = vcmask 293888   ;;  %s940_s27 = sshll.u32 %s1372_s18, 3 }
   0xe   : > { %s1163_s26 = scalar_lea.vmem %s1363_s0, %s938_s21  ;;  %s1201_s30 = scalar_lea.vmem %s1365_s2, %s940_s27 }
   0xf   : > { %v428_v2 = vpack.c.b16 %v425_v1, %v425_v1  ;;  %v1032_v6 = vld [vmem:[%s1163_s26] sm:$0xff]  ;;  %v1033_v10 = vld [vmem:[%s1163_s26 + $0x8] sm:$0xff]  ;;  %v1034_v14 = vld [vmem:[%s1163_s26 + $0x10] sm:$0xff]  ;;  %s1374_s12 = smov (!%p226_p5, %s1097_s12), 1 }
  0x10   : > { %v1036_v7 = vld [vmem:[%s1163_s26 + $0x20] sm:$0xff]  ;;  %v1037_v11 = vld [vmem:[%s1163_s26 + $0x28] sm:$0xff]  ;;  %v1038_v15 = vld [vmem:[%s1163_s26 + $0x30] sm:$0xff]  ;;  %s941_s4 = sshll.u32 %s1374_s12, 3 }
  0x11   : > { %v482_v3 = vsel %vm480_vm0, %v428_v2, 0  ;;  %v1040_v8 = vld [vmem:[%s1163_s26 + $0x40] sm:$0xff]  ;;  %v1041_v12 = vld [vmem:[%s1163_s26 + $0x48] sm:$0xff]  ;;  %v1042_v16 = vld [vmem:[%s1163_s26 + $0x50] sm:$0xff]  ;;  %s229_s7 = scalar_lea.vmem %s1366_s3, %s941_s4 }
  0x12   : > { %489 = vmatpush.bf16.msra.mxu0 %v482_v3  ;;  %1050 = vmatpush.bf16.msra.mxu1 %v482_v3  ;;  %v1044_v9 = vld [vmem:[%s1163_s26 + $0x60] sm:$0xff]  ;;  %v1045_v13 = vld [vmem:[%s1163_s26 + $0x68] sm:$0xff]  ;;  %v1046_v17 = vld [vmem:[%s1163_s26 + $0x70] sm:$0xff] }
  0x13   : > { %1051 = vmatpush.bf16.msra.mxu2 %v482_v3  ;;  %1052 = vmatpush.bf16.msra.mxu3 %v482_v3  ;;  %v1035_v18 = vld [vmem:[%s1163_s26 + $0x18] sm:$0xff] }
  0x14   : > { %v1039_v19 = vld [vmem:[%s1163_s26 + $0x38] sm:$0xff] }
  0x15   : > { %v1043_v20 = vld [vmem:[%s1163_s26 + $0x58] sm:$0xff] }
  0x16   : > { %490 = vmatpush.bf16.msra.mxu0 %v1049_v4  ;;  %1053 = vmatpush.bf16.msra.mxu1 %v1049_v4  ;;  %v1047_v21 = vld [vmem:[%s1163_s26 + $0x78] sm:$0xff] }
  0x17   : > { %1054 = vmatpush.bf16.msra.mxu2 %v1049_v4  ;;  %1055 = vmatpush.bf16.msra.mxu3 %v1049_v4 }
  0x1a   : > { %491 = vmatpush.bf16.msra.mxu0 %v1048_v5  ;;  %1056 = vmatpush.bf16.msra.mxu1 %v1048_v5 }
  0x1b   : > { %1057 = vmatpush.bf16.msra.mxu2 %v1048_v5  ;;  %1058 = vmatpush.bf16.msra.mxu3 %v1048_v5 }
  0x1d   : > { %1014 = vmatmul.msk.bf16.vlgmr.msra.gmra.mxu0 %vm431_vm1, %v1032_v6  ;;  %1018 = vmatmul.msk.bf16.vlgmr.msra.gmra.mxu1 %vm431_vm1, %v1036_v7 }
  0x1e   : > { %1022 = vmatmul.msk.bf16.vlgmr.msra.gmra.mxu2 %vm431_vm1, %v1040_v8  ;;  %1026 = vmatmul.msk.bf16.vlgmr.msra.gmra.mxu3 %vm431_vm1, %v1044_v9 }
  0x2d   : > { %1015 = vmatmul.msk.bf16.gmra.mxu0 %vm431_vm1, %v1033_v10  ;;  %1019 = vmatmul.msk.bf16.gmra.mxu1 %vm431_vm1, %v1037_v11 }
  0x2e   : > { %1023 = vmatmul.msk.bf16.gmra.mxu2 %vm431_vm1, %v1041_v12  ;;  %1027 = vmatmul.msk.bf16.gmra.mxu3 %vm431_vm1, %v1045_v13 }
  0x3d   : > { %1016 = vmatmul.msk.bf16.gmra.mxu0 %vm431_vm1, %v1034_v14  ;;  %1020 = vmatmul.msk.bf16.gmra.mxu1 %vm431_vm1, %v1038_v15 }
  0x3e   : > { %1024 = vmatmul.msk.bf16.gmra.mxu2 %vm431_vm1, %v1042_v16  ;;  %1028 = vmatmul.msk.bf16.gmra.mxu3 %vm431_vm1, %v1046_v17 }
  0x4d   : > { %1017 = vmatmul.msk.bf16.gmra.mxu0 %vm431_vm1, %v1035_v18  ;;  %1021 = vmatmul.msk.bf16.gmra.mxu1 %vm431_vm1, %v1039_v19 }
  0x4e   : > { %1025 = vmatmul.msk.bf16.gmra.mxu2 %vm431_vm1, %v1043_v20  ;;  %1029 = vmatmul.msk.bf16.gmra.mxu3 %vm431_vm1, %v1047_v21 }
  0x9a   : > { %v493_v22 = vpop.f32.mrf.mxu0  ;;  %v1203_v23 = vpop.f32.mrf.mxu1 }
  0x9b   : > { %672 = vst [vmem:[%s1201_s30] sm:$0xff] %v493_v22  ;;  %v741_v45 = vmul.f32 %v493_v22, %v493_v22  ;;  %v749_v9 = vmul.f32 %v1203_v23, %v1203_v23 }
  0x9c   : > { %680 = vst [vmem:[%s1201_s30 + $0x40] sm:$0xff] %v1203_v23 }
  0xa1   : > { %v1208_v24 = vpop.f32.mrf.mxu2  ;;  %v1215_v27 = vpop.f32.mrf.mxu3 }
  0xa2   : > { %v495_v25 = vpop.f32.mrf.mxu0  ;;  %v1210_v26 = vpop.f32.mrf.mxu1  ;;  %688 = vst [vmem:[%s1201_s30 + $0x80] sm:$0xff] %v1208_v24 }
  0xa3   : > { %673 = vst [vmem:[%s1201_s30 + $0x8] sm:$0xff] %v495_v25  ;;  %v742_v44 = vmul.f32 %v495_v25, %v495_v25  ;;  %v704_v46 = vadd.f32 %v495_v25, %v493_v22  ;;  %v750_v12 = vmul.f32 %v1210_v26, %v1210_v26 }
  0xa4   : > { %681 = vst [vmem:[%s1201_s30 + $0x48] sm:$0xff] %v1210_v26 }
  0xa5   : > { %696 = vst [vmem:[%s1201_s30 + $0xc0] sm:$0xff] %v1215_v27  ;;  %v773_v48 = vadd.f32 %v742_v44, %v741_v45 }
  0xa9   : > { %v1221_v28 = vpop.f32.mrf.mxu2  ;;  %v1228_v31 = vpop.f32.mrf.mxu3 }
  0xaa   : > { %v498_v29 = vpop.f32.mrf.mxu0  ;;  %v1223_v30 = vpop.f32.mrf.mxu1  ;;  %689 = vst [vmem:[%s1201_s30 + $0x88] sm:$0xff] %v1221_v28 }
  0xab   : > { %674 = vst [vmem:[%s1201_s30 + $0x10] sm:$0xff] %v498_v29  ;;  %v743_v47 = vmul.f32 %v498_v29, %v498_v29  ;;  %v705_v49 = vadd.f32 %v704_v46, %v498_v29  ;;  %v751_v15 = vmul.f32 %v1223_v30, %v1223_v30 }
  0xac   : > { %682 = vst [vmem:[%s1201_s30 + $0x50] sm:$0xff] %v1223_v30 }
  0xad   : > { %697 = vst [vmem:[%s1201_s30 + $0xc8] sm:$0xff] %v1228_v31  ;;  %v774_v54 = vadd.f32 %v773_v48, %v743_v47  ;;  %v757_v47 = vmul.f32 %v1208_v24, %v1208_v24 }
  0xb1   : > { %v1234_v32 = vpop.f32.mrf.mxu2  ;;  %v1241_v35 = vpop.f32.mrf.mxu3 }
  0xb2   : > { %v500_v33 = vpop.f32.mrf.mxu0  ;;  %v1236_v34 = vpop.f32.mrf.mxu1  ;;  %690 = vst [vmem:[%s1201_s30 + $0x90] sm:$0xff] %v1234_v32 }
  0xb3   : > { %675 = vst [vmem:[%s1201_s30 + $0x18] sm:$0xff] %v500_v33  ;;  %v744_v50 = vmul.f32 %v500_v33, %v500_v33  ;;  %v706_v55 = vadd.f32 %v705_v49, %v500_v33  ;;  %v752_v19 = vmul.f32 %v1236_v34, %v1236_v34 }
  0xb4   : > { %683 = vst [vmem:[%s1201_s30 + $0x58] sm:$0xff] %v1236_v34 }
  0xb5   : > { %698 = vst [vmem:[%s1201_s30 + $0xd0] sm:$0xff] %v1241_v35  ;;  %v775_v58 = vadd.f32 %v774_v54, %v744_v50 }
  0xb9   : > { %v1247_v36 = vpop.f32.mrf.mxu2  ;;  %v1254_v39 = vpop.f32.mrf.mxu3 }
  0xba   : > { %v503_v37 = vpop.f32.mrf.mxu0  ;;  %v1249_v38 = vpop.f32.mrf.mxu1  ;;  %691 = vst [vmem:[%s1201_s30 + $0x98] sm:$0xff] %v1247_v36 }
  0xbb   : > { %676 = vst [vmem:[%s1201_s30 + $0x20] sm:$0xff] %v503_v37  ;;  %v745_v56 = vmul.f32 %v503_v37, %v503_v37  ;;  %v707_v59 = vadd.f32 %v706_v55, %v503_v37  ;;  %v760_v55 = vmul.f32 %v1247_v36, %v1247_v36 }
  0xbc   : > { %684 = vst [vmem:[%s1201_s30 + $0x60] sm:$0xff] %v1249_v38 }
  0xbd   : > { %699 = vst [vmem:[%s1201_s30 + $0xd8] sm:$0xff] %v1254_v39  ;;  %v776_v61 = vadd.f32 %v775_v58, %v745_v56 }
  0xc1   : > { %v1260_v40 = vpop.f32.mrf.mxu2  ;;  %v1267_v43 = vpop.f32.mrf.mxu3 }
  0xc2   : > { %v505_v41 = vpop.f32.mrf.mxu0  ;;  %v1262_v42 = vpop.f32.mrf.mxu1  ;;  %692 = vst [vmem:[%s1201_s30 + $0xa0] sm:$0xff] %v1260_v40 }
  0xc3   : > { %677 = vst [vmem:[%s1201_s30 + $0x28] sm:$0xff] %v505_v41  ;;  %v746_v60 = vmul.f32 %v505_v41, %v505_v41  ;;  %v708_v62 = vadd.f32 %v707_v59, %v505_v41  ;;  %v754_v29 = vmul.f32 %v1262_v42, %v1262_v42 }
  0xc4   : > { %685 = vst [vmem:[%s1201_s30 + $0x68] sm:$0xff] %v1262_v42 }
  0xc5   : > { %700 = vst [vmem:[%s1201_s30 + $0xe0] sm:$0xff] %v1267_v43  ;;  %v777_v0 = vadd.f32 %v776_v61, %v746_v60 }
  0xc9   : > { %v1273_v51 = vpop.f32.mrf.mxu2  ;;  %v1278_v57 = vpop.f32.mrf.mxu3 }
  0xca   : > { %v508_v52 = vpop.f32.mrf.mxu0  ;;  %v528_v53 = vpop.f32.mrf.mxu1  ;;  %693 = vst [vmem:[%s1201_s30 + $0xa8] sm:$0xff] %v1273_v51  ;;  %v762_v61 = vmul.f32 %v1273_v51, %v1273_v51 }
  0xcb   : > { %678 = vst [vmem:[%s1201_s30 + $0x30] sm:$0xff] %v508_v52  ;;  %v747_v63 = vmul.f32 %v508_v52, %v508_v52  ;;  %v709_v1 = vadd.f32 %v708_v62, %v508_v52  ;;  %v755_v41 = vmul.f32 %v528_v53, %v528_v53 }
  0xcc   : > { %686 = vst [vmem:[%s1201_s30 + $0x70] sm:$0xff] %v528_v53 }
  0xcd   : > { %701 = vst [vmem:[%s1201_s30 + $0xe8] sm:$0xff] %v1278_v57  ;;  %v778_v5 = vadd.f32 %v777_v0, %v747_v63 }
  0xd1   : > { %v548_v2 = vpop.f32.mrf.mxu2  ;;  %v1285_v8 = vpop.f32.mrf.mxu3 }
  0xd2   : > { %v510_v3 = vpop.f32.mrf.mxu0  ;;  %v530_v4 = vpop.f32.mrf.mxu1  ;;  %694 = vst [vmem:[%s1201_s30 + $0xb0] sm:$0xff] %v548_v2  ;;  %v763_v0 = vmul.f32 %v548_v2, %v548_v2 }
  0xd3   : > { %679 = vst [vmem:[%s1201_s30 + $0x38] sm:$0xff] %v510_v3  ;;  %v710_v6 = vadd.f32 %v709_v1, %v510_v3  ;;  %v748_v7 = vmul.f32 %v510_v3, %v510_v3 }
  0xd4   : > { %687 = vst [vmem:[%s1201_s30 + $0x78] sm:$0xff] %v530_v4 }
  0xd5   : > { %v711_v10 = vadd.f32 %v710_v6, %v1203_v23  ;;  %v779_v11 = vadd.f32 %v778_v5, %v748_v7  ;;  %702 = vst [vmem:[%s1201_s30 + $0xf0] sm:$0xff] %v1285_v8  ;;  %v753_v23 = vmul.f32 %v1249_v38, %v1249_v38 }
  0xd7   : > { %v712_v13 = vadd.f32 %v711_v10, %v1210_v26  ;;  %v780_v14 = vadd.f32 %v779_v11, %v749_v9  ;;  %v768_v11 = vmul.f32 %v1254_v39, %v1254_v39 }
  0xd9   : > { %v713_v16 = vadd.f32 %v712_v13, %v1223_v30  ;;  %v781_v17 = vadd.f32 %v780_v14, %v750_v12  ;;  %v550_v18 = vpop.f32.mrf.mxu2  ;;  %v570_v22 = vpop.f32.mrf.mxu3  ;;  %v769_v13 = vmul.f32 %v1267_v43, %v1267_v43 }
  0xda   : > { %695 = vst [vmem:[%s1201_s30 + $0xb8] sm:$0xff] %v550_v18 }
  0xdb   : > { %v782_v20 = vadd.f32 %v781_v17, %v751_v15  ;;  %v714_v21 = vadd.f32 %v713_v16, %v1236_v34  ;;  %703 = vst [vmem:[%s1201_s30 + $0xf8] sm:$0xff] %v570_v22  ;;  %v756_v34 = vmul.f32 %v530_v4, %v530_v4  ;;  %v770_v16 = vmul.f32 %v1278_v57, %v1278_v57 }
  0xdd   : > { %v715_v25 = vadd.f32 %v714_v21, %v1249_v38  ;;  %v783_v26 = vadd.f32 %v782_v20, %v752_v19  ;;  %v758_v38 = vmul.f32 %v1221_v28, %v1221_v28  ;;  %v771_v19 = vmul.f32 %v1285_v8, %v1285_v8 }
  0xde   : > { %v772_v21 = vmul.f32 %v570_v22, %v570_v22 }
  0xdf   : > { %v716_v30 = vadd.f32 %v715_v25, %v1262_v42  ;;  %v784_v33 = vadd.f32 %v783_v26, %v753_v23  ;;  %v759_v42 = vmul.f32 %v1234_v32, %v1234_v32 }
  0xe1   : > { %v717_v37 = vadd.f32 %v716_v30, %v528_v53  ;;  %v785_v44 = vadd.f32 %v784_v33, %v754_v29  ;;  %v810_v29 = vlaneseq }
  0xe3   : > { %v786_v45 = vadd.f32 %v785_v44, %v755_v41  ;;  %v718_v46 = vadd.f32 %v717_v37, %v530_v4  ;;  %v764_v4 = vmul.f32 %v550_v18, %v550_v18  ;;  %v811_v41 = vshrl.u32 %v810_v29, 7 }
  0xe5   : > { %v719_v48 = vadd.f32 %v718_v46, %v1208_v24  ;;  %v787_v49 = vadd.f32 %v786_v45, %v756_v34  ;;  %v761_v24 = vmul.f32 %v1260_v40, %v1260_v40  ;;  %vm813_vm2 = vcmp.eq.s32.totalorder %v811_v41, 1 }
  0xe6   : > { %vm812_vm3 = vcmp.eq.s32.totalorder %v811_v41, 0 }
  0xe7   : > { %v720_v50 = vadd.f32 %v719_v48, %v1221_v28  ;;  %v788_v52 = vadd.f32 %v787_v49, %v757_v47 }
  0xe9   : > { %v721_v53 = vadd.f32 %v720_v50, %v1234_v32  ;;  %v789_v54 = vadd.f32 %v788_v52, %v758_v38 }
  0xeb   : > { %v790_v56 = vadd.f32 %v789_v54, %v759_v42  ;;  %v722_v58 = vadd.f32 %v721_v53, %v1247_v36  ;;  %v765_v36 = vmul.f32 %v1215_v27, %v1215_v27 }
  0xed   : > { %v723_v59 = vadd.f32 %v722_v58, %v1260_v40  ;;  %v791_v60 = vadd.f32 %v790_v56, %v760_v55  ;;  %v766_v40 = vmul.f32 %v1228_v31, %v1228_v31 }
  0xef   : > { %v724_v28 = vadd.f32 %v723_v59, %v1273_v51  ;;  %v792_v62 = vadd.f32 %v791_v60, %v761_v24  ;;  %v767_v51 = vmul.f32 %v1241_v35, %v1241_v35 }
  0xf1   : > { %v793_v32 = vadd.f32 %v792_v62, %v762_v61  ;;  %v725_v63 = vadd.f32 %v724_v28, %v548_v2 }
  0xf3   : > { %v794_v1 = vadd.f32 %v793_v32, %v763_v0  ;;  %v726_v3 = vadd.f32 %v725_v63, %v550_v18 }
  0xf5   : > { %v727_v5 = vadd.f32 %v726_v3, %v1215_v27  ;;  %v795_v6 = vadd.f32 %v794_v1, %v764_v4 }
  0xf7   : > { %v728_v7 = vadd.f32 %v727_v5, %v1228_v31  ;;  %v796_v9 = vadd.f32 %v795_v6, %v765_v36 }
  0xf9   : > { %v729_v2 = vadd.f32 %v728_v7, %v1241_v35  ;;  %v797_v10 = vadd.f32 %v796_v9, %v766_v40 }
  0xfb   : > { %v798_v12 = vadd.f32 %v797_v10, %v767_v51  ;;  %v730_v27 = vadd.f32 %v729_v2, %v1254_v39 }
  0xfd   : > { %v731_v14 = vadd.f32 %v730_v27, %v1267_v43  ;;  %v799_v31 = vadd.f32 %v798_v12, %v768_v11 }
  0xff   : > { %v732_v15 = vadd.f32 %v731_v14, %v1278_v57  ;;  %v800_v35 = vadd.f32 %v799_v31, %v769_v13 }
 0x101   : > { %v801_v17 = vadd.f32 %v800_v35, %v770_v16  ;;  %v733_v18 = vadd.f32 %v732_v15, %v1285_v8 }
 0x103   : > { %v802_v39 = vadd.f32 %v801_v17, %v771_v19  ;;  %v734_v20 = vadd.f32 %v733_v18, %v570_v22 }
 0x105   : > { %v735_v23 = vrot.slane %v734_v20, 4  ;;  %v803_v25 = vadd.f32 %v802_v39, %v772_v21 }
 0x107   : > { %v736_v43 = vadd.f32 %v735_v23, %v734_v20  ;;  %v804_v26 = vrot.slane %v803_v25, 4 }
 0x109   : > { %v737_v30 = vrot.slane %v736_v43, 2  ;;  %v805_v33 = vadd.f32 %v804_v26, %v803_v25 }
 0x10b   : > { %v738_v57 = vadd.f32 %v737_v30, %v736_v43  ;;  %v806_v37 = vrot.slane %v805_v33, 2 }
 0x10d   : > { %v807_v44 = vadd.f32 %v806_v37, %v805_v33  ;;  %v739_v45 = vrot.slane %v738_v57, 1 }
 0x10f   : > { %v808_v46 = vrot.slane %v807_v44, 1  ;;  %v740_v22 = vadd.f32 %v739_v45, %v738_v57 }
 0x111   : > { %v809_v8 = vadd.f32 %v808_v46, %v807_v44 }
 0x113   : > { %v814_v34 = vsel %vm813_vm2, %v809_v8, 0.0 }
 0x114   : > { %v815_v47 = vsel %vm812_vm3, %v740_v22, %v814_v34 }
 0x115   : > { %816 = vst [vmem:[%s229_s7] sm:$0xff] %v815_v47 }
 0x116 PF: > { %s14_s14 = sadd.s32 1, %s1105_s14   ;;  %s1367_s12 = smov %s1101_s13 }
 0x117   : > { %p11_p6 = scmp.ge.s32.totalorder %s14_s14, 4   ;;  %s1368_s13 = smov %s1370_s15 }
 0x119   :  { %13 = sbr.rel (!%p11_p6) target bundleno = 2 (0x2), region = 81 }

</bundles_post_ra>
